<compile_context>
chip_gen: v7x
topology: tpu7x:2x2x1
jax: 0.10.0
libtpu: 0.0.40
codegen_flags: <defaults>
</compile_context>

<pallas_src>
import functools
import math

import jax
import jax.numpy as jnp
from jax import lax
from jax.experimental import pallas as pl
from jax.experimental.pallas import tpu as pltpu

SIGMA = 0.1  # GaussianNoise default
_TWO_PI = 2.0 * math.pi
_INV_2_24 = 1.0 / (1 << 24)


def _mix32(h):
    """lowbias32 integer mixer: cheap VPU ops, strong avalanche."""
    h = h ^ (h >> 16)
    h = h * jnp.uint32(0x7FEB352D)
    h = h ^ (h >> 15)
    h = h * jnp.uint32(0x846CA68B)
    h = h ^ (h >> 16)
    return h


def _uniform_pair(rows_u32, cols_u32, seed_u32):
    """Two independent uniforms per (row, col) counter: u1 in (0,1], u2 in [0,1)."""
    h = _mix32(cols_u32 + seed_u32 * jnp.uint32(0x9E3779B1))
    h = _mix32(h ^ (rows_u32 * jnp.uint32(0x85EBCA77)))
    b1 = _mix32(h ^ jnp.uint32(0x68BC21EB))
    b2 = _mix32(h ^ jnp.uint32(0x02E5BE93))
    # Keep the high 24 bits; go uint32 -> int32 -> float32 (values < 2^24, exact).
    u1 = ((b1 >> 8).astype(jnp.int32).astype(jnp.float32) + 1.0) * jnp.float32(_INV_2_24)
    u2 = (b2 >> 8).astype(jnp.int32).astype(jnp.float32) * jnp.float32(_INV_2_24)
    return u1, u2


def _global_coords(shape, row_off, col_off):
    r = lax.broadcasted_iota(jnp.int32, shape, 0) + row_off
    c = lax.broadcasted_iota(jnp.int32, shape, 1) + col_off
    return r.astype(jnp.uint32), c.astype(jnp.uint32)


def gaussian_noise_kernel(seed_ref, x_ref, o_ref, *, sigma, tm, tn, dual):
    row_off = pl.program_id(0) * tm
    col_off = pl.program_id(1) * tn
    seed_u32 = seed_ref[0].astype(jnp.uint32)

    if dual:
        # Dual-output Box-Muller: one (u1,u2) pair -> (r*cos, r*sin) covering the
        # two lane-dense halves of the tile.  Halves the EUP work per element.
        half = tn // 2
        r_u, c_u = _global_coords((tm, half), row_off, col_off)
        u1, u2 = _uniform_pair(r_u, c_u, seed_u32)
        rad = jnp.sqrt(-2.0 * jnp.log(u1))
        theta = jnp.float32(_TWO_PI) * u2
        noise = jnp.concatenate([rad * jnp.cos(theta), rad * jnp.sin(theta)], axis=-1)
    else:
        r_u, c_u = _global_coords((tm, tn), row_off, col_off)
        u1, u2 = _uniform_pair(r_u, c_u, seed_u32)
        noise = jnp.sqrt(-2.0 * jnp.log(u1)) * jnp.cos(jnp.float32(_TWO_PI) * u2)

    x = x_ref[...]
    gain = 1.0 + sigma * noise                  # float32
    if x.dtype != jnp.float32:
        gain = gain.astype(x.dtype)             # keep the multiply in the native dtype
    o_ref[...] = (x * gain).astype(o_ref.dtype)


_LANE_TILES = (4096, 2048, 1024, 512, 256, 128)


def _pick_lane_tile(D):
    for t in _LANE_TILES:
        if t <= D and D % t == 0:
            return t
    # D not a multiple of 128: full extent if modest, otherwise a bounded
    # lane-aligned tile with a masked tail block (OOB writes are dropped).
    return D if D <= 4096 else 2048


def _pick_row_tile(rows, tn, itemsize, target_bytes=4 << 20):
    tm = max(1, target_bytes // (tn * itemsize))
    tm = min(tm, rows, 1024)
    if tm < rows:
        tm = max(8, (tm // 8) * 8)  # sublane-aligned when not full extent
    return int(tm)


def gaussian_noise(x, seed, *, sigma=SIGMA, training=True):
    """Pallas GaussianNoise forward.  x: any rank (last dim = features)."""
    if not training or sigma == 0.0:
        # PyTorch eval-mode / sigma==0 short-circuit: identity, no kernel launch.
        return x

    orig_shape = x.shape
    D = orig_shape[-1]
    rows = math.prod(orig_shape[:-1]) if len(orig_shape) > 1 else 1
    x2 = x.reshape(rows, D)
    seed = jnp.asarray(seed, dtype=jnp.int32).reshape((1,))

    itemsize = x2.dtype.itemsize
    tn = _pick_lane_tile(D)
    tm = _pick_row_tile(rows, tn, itemsize)

    # Ensure >= 2 grid steps when possible so both v7x TensorCores get work.
    if pl.cdiv(rows, tm) * pl.cdiv(D, tn) < 2:
        if tn % 256 == 0:
            tn //= 2
        elif tm % 16 == 0:
            tm //= 2

    grid = (pl.cdiv(rows, tm), pl.cdiv(D, tn))
    dual = (tn % 2 == 0)

    tile_bytes = tm * tn * itemsize
    # in + out tiles double-buffered plus f32 noise intermediates, with headroom.
    vmem_limit = int(min(32 << 20, max(4 << 20, 8 * tile_bytes)))

    kernel = functools.partial(
        gaussian_noise_kernel, sigma=float(sigma), tm=tm, tn=tn, dual=dual)

    y = pl.pallas_call(
        kernel,
        out_shape=jax.ShapeDtypeStruct((rows, D), x2.dtype),
        grid_spec=pltpu.PrefetchScalarGridSpec(
            num_scalar_prefetch=1,
            grid=grid,
            in_specs=[pl.BlockSpec((tm, tn), lambda i, j, _seed: (i, j))],
            out_specs=pl.BlockSpec((tm, tn), lambda i, j, _seed: (i, j)),
        ),
        compiler_params=pltpu.CompilerParams(
            dimension_semantics=("parallel", "parallel"),
            vmem_limit_bytes=vmem_limit,
        ),
    )(seed, x2)
    return y.reshape(orig_shape)


if __name__ == "__main__":
    key = jax.random.PRNGKey(0)
    k1, k2 = jax.random.split(key)
    seed = jnp.array([42], dtype=jnp.int32)

    # Small embedding-like activation: (batch=2, seq=8, hidden=1024).
    x = jax.random.normal(k1, (2, 8, 1024), dtype=jnp.float32)
    y = jax.block_until_ready(gaussian_noise(x, seed, sigma=SIGMA, training=True))
    assert y.shape == x.shape and y.dtype == x.dtype
    assert bool(jnp.all(jnp.isfinite(y)))

    # Recover the per-element noise: y = x*(1 + sigma*n)  =>  n = (y/x - 1)/sigma.
    def noise_stats(xv, yv):
        mask = jnp.abs(xv) > 1e-6
        n = jnp.where(mask, (yv / xv - 1.0) / SIGMA, 0.0)
        cnt = jnp.sum(mask)
        mean = jnp.sum(n) / cnt
        var = jnp.sum(jnp.where(mask, (n - mean) ** 2, 0.0)) / cnt
        return float(mean), float(jnp.sqrt(var))

    mean, std = noise_stats(x, y)
    assert abs(mean) < 0.06, f"noise mean too far from 0: {mean}"
    assert abs(std - 1.0) < 0.06, f"noise std too far from 1: {std}"

    # Slightly larger 2-D input exercising a multi-step grid.
    x2 = jax.random.normal(k2, (64, 1024), dtype=jnp.float32)
    y2 = jax.block_until_ready(gaussian_noise(x2, seed, sigma=SIGMA, training=True))
    mean2, std2 = noise_stats(x2, y2)
    assert abs(mean2) < 0.04, f"noise mean too far from 0: {mean2}"
    assert abs(std2 - 1.0) < 0.04, f"noise std too far from 1: {std2}"

    # Different rows get different noise (per-element counter hash).
    n2 = (y2 / x2 - 1.0) / SIGMA
    assert not bool(jnp.allclose(n2[:32], n2[32:], atol=1e-3))

    # Eval mode / sigma == 0 is the identity, matching PyTorch semantics.
    y_eval = gaussian_noise(x, seed, sigma=SIGMA, training=False)
    assert bool(jnp.all(y_eval == x))

    print("KERNEL_OK")
</pallas_src>

<mosaic_0001>
module attributes {stable_mosaic.version = 11 : i64} {
  func.func @gaussian_noise_kernel(%arg0: i32, %arg1: i32, %arg2: memref<1xi32, #tpu.memory_space<smem>>, %arg3: memref<16x512xf32, #tpu.memory_space<vmem>>, %arg4: memref<16x512xf32, #tpu.memory_space<vmem>>) attributes {dimension_semantics = [#tpu.dimension_semantics<parallel>, #tpu.dimension_semantics<parallel>], iteration_bounds = array<i64: 1, 2>, scalar_prefetch = 1 : i64, scratch_operands = 0 : i64, tpu.core_type = #tpu.core_type<tc>, window_params = [{transform_indices = @transform_0, window_bounds = array<i64: 16, 512>}, {transform_indices = @transform_1, window_bounds = array<i64: 16, 512>}]} {
    %c16_i32 = arith.constant 16 : i32
    %0 = arith.muli %arg0, %c16_i32 : i32
    %c512_i32 = arith.constant 512 : i32
    %1 = arith.muli %arg1, %c512_i32 : i32
    %c0 = arith.constant 0 : index
    %2 = memref.load %arg2[%c0] : memref<1xi32, #tpu.memory_space<smem>>
    %3 = tpu.iota {dimensions = array<i32: 0>} : vector<16x256xi32>
    %4 = vector.broadcast %0 : i32 to vector<16x256xi32>
    %5 = arith.addi %3, %4 : vector<16x256xi32>
    %6 = tpu.iota {dimensions = array<i32: 1>} : vector<16x256xi32>
    %7 = vector.broadcast %1 : i32 to vector<16x256xi32>
    %8 = arith.addi %6, %7 : vector<16x256xi32>
    %c-1640531535_i32 = arith.constant -1640531535 : i32
    %9 = arith.muli %2, %c-1640531535_i32 : i32
    %10 = vector.broadcast %9 : i32 to vector<16x256xi32>
    %11 = arith.addi %8, %10 : vector<16x256xi32>
    %c16_i32_0 = arith.constant 16 : i32
    %12 = vector.broadcast %c16_i32_0 : i32 to vector<16x256xi32>
    %13 = arith.shrui %11, %12 : vector<16x256xi32>
    %14 = arith.xori %11, %13 : vector<16x256xi32>
    %c2146121005_i32 = arith.constant 2146121005 : i32
    %15 = vector.broadcast %c2146121005_i32 : i32 to vector<16x256xi32>
    %16 = arith.muli %14, %15 : vector<16x256xi32>
    %c15_i32 = arith.constant 15 : i32
    %17 = vector.broadcast %c15_i32 : i32 to vector<16x256xi32>
    %18 = arith.shrui %16, %17 : vector<16x256xi32>
    %19 = arith.xori %16, %18 : vector<16x256xi32>
    %c-2073254261_i32 = arith.constant -2073254261 : i32
    %20 = vector.broadcast %c-2073254261_i32 : i32 to vector<16x256xi32>
    %21 = arith.muli %19, %20 : vector<16x256xi32>
    %c16_i32_1 = arith.constant 16 : i32
    %22 = vector.broadcast %c16_i32_1 : i32 to vector<16x256xi32>
    %23 = arith.shrui %21, %22 : vector<16x256xi32>
    %24 = arith.xori %21, %23 : vector<16x256xi32>
    %c-2048144777_i32 = arith.constant -2048144777 : i32
    %25 = vector.broadcast %c-2048144777_i32 : i32 to vector<16x256xi32>
    %26 = arith.muli %5, %25 : vector<16x256xi32>
    %27 = arith.xori %24, %26 : vector<16x256xi32>
    %c16_i32_2 = arith.constant 16 : i32
    %28 = vector.broadcast %c16_i32_2 : i32 to vector<16x256xi32>
    %29 = arith.shrui %27, %28 : vector<16x256xi32>
    %30 = arith.xori %27, %29 : vector<16x256xi32>
    %c2146121005_i32_3 = arith.constant 2146121005 : i32
    %31 = vector.broadcast %c2146121005_i32_3 : i32 to vector<16x256xi32>
    %32 = arith.muli %30, %31 : vector<16x256xi32>
    %c15_i32_4 = arith.constant 15 : i32
    %33 = vector.broadcast %c15_i32_4 : i32 to vector<16x256xi32>
    %34 = arith.shrui %32, %33 : vector<16x256xi32>
    %35 = arith.xori %32, %34 : vector<16x256xi32>
    %c-2073254261_i32_5 = arith.constant -2073254261 : i32
    %36 = vector.broadcast %c-2073254261_i32_5 : i32 to vector<16x256xi32>
    %37 = arith.muli %35, %36 : vector<16x256xi32>
    %c16_i32_6 = arith.constant 16 : i32
    %38 = vector.broadcast %c16_i32_6 : i32 to vector<16x256xi32>
    %39 = arith.shrui %37, %38 : vector<16x256xi32>
    %40 = arith.xori %37, %39 : vector<16x256xi32>
    %c1757159915_i32 = arith.constant 1757159915 : i32
    %41 = vector.broadcast %c1757159915_i32 : i32 to vector<16x256xi32>
    %42 = arith.xori %40, %41 : vector<16x256xi32>
    %c16_i32_7 = arith.constant 16 : i32
    %43 = vector.broadcast %c16_i32_7 : i32 to vector<16x256xi32>
    %44 = arith.shrui %42, %43 : vector<16x256xi32>
    %45 = arith.xori %42, %44 : vector<16x256xi32>
    %c2146121005_i32_8 = arith.constant 2146121005 : i32
    %46 = vector.broadcast %c2146121005_i32_8 : i32 to vector<16x256xi32>
    %47 = arith.muli %45, %46 : vector<16x256xi32>
    %c15_i32_9 = arith.constant 15 : i32
    %48 = vector.broadcast %c15_i32_9 : i32 to vector<16x256xi32>
    %49 = arith.shrui %47, %48 : vector<16x256xi32>
    %50 = arith.xori %47, %49 : vector<16x256xi32>
    %c-2073254261_i32_10 = arith.constant -2073254261 : i32
    %51 = vector.broadcast %c-2073254261_i32_10 : i32 to vector<16x256xi32>
    %52 = arith.muli %50, %51 : vector<16x256xi32>
    %c16_i32_11 = arith.constant 16 : i32
    %53 = vector.broadcast %c16_i32_11 : i32 to vector<16x256xi32>
    %54 = arith.shrui %52, %53 : vector<16x256xi32>
    %55 = arith.xori %52, %54 : vector<16x256xi32>
    %c48610963_i32 = arith.constant 48610963 : i32
    %56 = vector.broadcast %c48610963_i32 : i32 to vector<16x256xi32>
    %57 = arith.xori %40, %56 : vector<16x256xi32>
    %c16_i32_12 = arith.constant 16 : i32
    %58 = vector.broadcast %c16_i32_12 : i32 to vector<16x256xi32>
    %59 = arith.shrui %57, %58 : vector<16x256xi32>
    %60 = arith.xori %57, %59 : vector<16x256xi32>
    %c2146121005_i32_13 = arith.constant 2146121005 : i32
    %61 = vector.broadcast %c2146121005_i32_13 : i32 to vector<16x256xi32>
    %62 = arith.muli %60, %61 : vector<16x256xi32>
    %c15_i32_14 = arith.constant 15 : i32
    %63 = vector.broadcast %c15_i32_14 : i32 to vector<16x256xi32>
    %64 = arith.shrui %62, %63 : vector<16x256xi32>
    %65 = arith.xori %62, %64 : vector<16x256xi32>
    %c-2073254261_i32_15 = arith.constant -2073254261 : i32
    %66 = vector.broadcast %c-2073254261_i32_15 : i32 to vector<16x256xi32>
    %67 = arith.muli %65, %66 : vector<16x256xi32>
    %c16_i32_16 = arith.constant 16 : i32
    %68 = vector.broadcast %c16_i32_16 : i32 to vector<16x256xi32>
    %69 = arith.shrui %67, %68 : vector<16x256xi32>
    %70 = arith.xori %67, %69 : vector<16x256xi32>
    %c8_i32 = arith.constant 8 : i32
    %71 = vector.broadcast %c8_i32 : i32 to vector<16x256xi32>
    %72 = arith.shrui %55, %71 : vector<16x256xi32>
    %73 = arith.sitofp %72 : vector<16x256xi32> to vector<16x256xf32>
    %cst = arith.constant 1.000000e+00 : f32
    %74 = vector.broadcast %cst : f32 to vector<16x256xf32>
    %75 = arith.addf %73, %74 : vector<16x256xf32>
    %cst_17 = arith.constant 5.96046448E-8 : f32
    %76 = vector.broadcast %cst_17 : f32 to vector<16x256xf32>
    %77 = arith.mulf %75, %76 : vector<16x256xf32>
    %c8_i32_18 = arith.constant 8 : i32
    %78 = vector.broadcast %c8_i32_18 : i32 to vector<16x256xi32>
    %79 = arith.shrui %70, %78 : vector<16x256xi32>
    %80 = arith.sitofp %79 : vector<16x256xi32> to vector<16x256xf32>
    %cst_19 = arith.constant 5.96046448E-8 : f32
    %81 = vector.broadcast %cst_19 : f32 to vector<16x256xf32>
    %82 = arith.mulf %80, %81 : vector<16x256xf32>
    %83 = math.log %77 : vector<16x256xf32>
    %cst_20 = arith.constant -2.000000e+00 : f32
    %84 = vector.broadcast %cst_20 : f32 to vector<16x256xf32>
    %85 = arith.mulf %84, %83 : vector<16x256xf32>
    %86 = math.sqrt %85 : vector<16x256xf32>
    %cst_21 = arith.constant 6.28318548 : f32
    %87 = vector.broadcast %cst_21 : f32 to vector<16x256xf32>
    %88 = arith.mulf %87, %82 : vector<16x256xf32>
    %89 = math.cos %88 : vector<16x256xf32>
    %90 = arith.mulf %86, %89 : vector<16x256xf32>
    %91 = math.sin %88 : vector<16x256xf32>
    %92 = arith.mulf %86, %91 : vector<16x256xf32>
    %93 = tpu.concatenate %90, %92 in 1 : vector<16x256xf32>, vector<16x256xf32> -> vector<16x512xf32>
    %c0_22 = arith.constant 0 : index
    %c0_23 = arith.constant 0 : index
    %94 = vector.load %arg3[%c0_22, %c0_23] : memref<16x512xf32, #tpu.memory_space<vmem>>, vector<16x512xf32>
    %cst_24 = arith.constant 1.000000e-01 : f32
    %95 = vector.broadcast %cst_24 : f32 to vector<16x512xf32>
    %96 = arith.mulf %95, %93 : vector<16x512xf32>
    %cst_25 = arith.constant 1.000000e+00 : f32
    %97 = vector.broadcast %cst_25 : f32 to vector<16x512xf32>
    %98 = arith.addf %97, %96 : vector<16x512xf32>
    %99 = arith.mulf %94, %98 : vector<16x512xf32>
    %c0_26 = arith.constant 0 : index
    %c0_27 = arith.constant 0 : index
    %100 = vector.load %arg4[%c0_26, %c0_27] : memref<16x512xf32, #tpu.memory_space<vmem>>, vector<16x512xf32>
    tpu.vector_store %arg4[%c0_26, %c0_27], %99 {strides = array<i32>} : memref<16x512xf32, #tpu.memory_space<vmem>>, vector<16x512xf32>,
    return
  }
  func.func @transform_0(%arg0: i32, %arg1: i32, %arg2: memref<1xi32, #tpu.memory_space<smem>>) -> (i32, i32) {
    %c0_i32 = arith.constant 0 : i32
    return %arg0, %arg1 : i32, i32
  }
  func.func @transform_1(%arg0: i32, %arg1: i32, %arg2: memref<1xi32, #tpu.memory_space<smem>>) -> (i32, i32) {
    %c0_i32 = arith.constant 0 : i32
    return %arg0, %arg1 : i32, i32
  }
}

</mosaic_0001>

<bundles_post_ra>
// kernel: tpu_custom_call.1
= control target key start
LH: loop header
LB: loop body
LE: loop exit
PB: predicated region body
PF: predicated region fallthrough
CT: control target
= control target key end

     0   :  { %s2301_s0 = inlined_call_operand.<no memory space> [shape: s32[1], index: 0, kind: input, shape index: {}]   ;;  %s2302_s1 = inlined_call_operand.hbm [shape: f32[16,1024], index: 1, kind: input, shape index: {}]   ;;  %s2303_s2 = inlined_call_operand.hbm [shape: f32[16,1024], index: 2, kind: output, shape index: {}]  }
   0x1   :  { %7 = sst [smem:[#allocation3]] %s2301_s0 }
   0x2   :  { %8 = vsyncpa [#allocation5], 0 }
   0x3   :  { %10 = vsyncpa [#allocation5 + $0x1], 0 }
   0x4   :  { %11 = vsyncpa [#allocation6], 0 }
   0x5   :  { %13 = vsyncpa [#allocation6 + $0x1], 0  ;;  %s1675_s11 = smov 0   ;;  %s1677_s12 = smov 0  }
   0x6   :  { %s1679_s13 = smov 0   ;;  %s1681_s14 = smov 0  }
   0x7   :  { %s1683_s15 = smov 0   ;;  %s1685_s16 = smov 0  }
   0x8 LB: > { %s1357_s0 = sadd.s32 4294967295, %s1641_s16   ;;  %s1358_s17 = sadd.s32 4294967294, %s1641_s16   ;;  %s1641_s16 = sphi %s1685_s16, %s19_s16   ;;  %s1637_s15 = sphi %s1683_s15, %s2323_s15   ;;  %s1633_s14 = sphi %s1681_s14, %s2322_s14   ;;  %s1629_s13 = sphi %s1679_s13, %s2321_s13   ;;  %s1625_s12 = sphi %s1677_s12, %s2320_s12   ;;  %s1621_s11 = sphi %s1675_s11, %s2319_s11  }
   0x9   : > { %s28_s18 = sadd.s32 1, %s1637_s15  ;;  %s40_s19 = sadd.s32 1, %s1629_s13 }
   0xa   : > { %p29_p0 = scmp.ge.s32.totalorder %s28_s18, 2  ;;  %p47_p1 = scmp.ne.s32.totalorder %s1629_s13, %s1625_s12 }
   0xb   : > { %p48_p2 = scmp.eq.s32.totalorder %s1641_s16, 0  ;;  %p53_p3 = scmp.ne.s32.totalorder %s1625_s12, %s1621_s11 }
   0xc   : > { %s2325_s18 = smov (%p29_p0, %s28_s18), 0  ;;  %p54_p5 = scmp.eq.s32.totalorder %s1357_s0, 0 }
   0xd   : > { %p1716_p4 = por %p48_p2, %p47_p1  ;;  %s36_s21 = ssub.s32 %s1637_s15, %s2325_s18 }
   0xe   : > { %p79_p6 = scmp.eq.s32.totalorder %s1357_s0, 1  ;;  %p38_p7 = scmp.eq.s32.totalorder %s36_s21, 0 }
   0xf   : > { %p1722_p8 = por %p54_p5, %p53_p3  ;;  %p85_p10 = scmp.eq.s32.totalorder %s1358_s17, 1 }
  0x10   : > { %p1726_p9 = por %p79_p6, %p47_p1  ;;  %p1435_p13 = scmp.lt.s32.totalorder %s1641_s16, 2 }
  0x11   : > { %s1731_s24 = scalar_select %p38_p7, %s1629_s13, %s40_s19  }
  0x12   : > { %s2307_s23 = scalar_select %p1726_p9, 1, 0 }
  0x13   : > { %p1733_p11 = por %p85_p10, %p53_p3  ;;  %s105_s26 = sand.u32 1, %s1629_s13  }
  0x14   : > { %s1361_s27 = sshll.u32 %s105_s26, 6  ;;  %s1405_s28 = sshll.u32 %s1637_s15, 9 }
  0x15   : > { %s2308_s25 = scalar_select %p1733_p11, 1, 0 }
  0x16   : > { %s1744_s3 = scalar_lea.hbm %s2302_s1, %s1405_s28  ;;  %s109_s4 = scalar_lea.vmem [#allocation4], %s1361_s27 }
  0x17   : > { %s119_s5 = sshll.u32 %s109_s4, 4  ;;  %p1750_p0 = pnand %p1435_p13, %p1716_p4  ;;  %s1746_s5 = int_to_ptr.vmem [resolvable:$true] %s119_s5 }
  0x18   : > { %s1754_s7 = scalar_lea.sflag [#allocation5], %s105_s26  ;;  %s1529_s8 = scalar_lea.hbm %s1744_s3, 1024 }
  0x19   : > { %p1530_p1 = scmp.ne.s32.totalorder %s1744_s3, %s1529_s8  ;;  %p1531_p2 = pneg %p1750_p0 }
  0x1a   : > { %s1534_s0 = scalar_lea.hbm %s2302_s1, 2048  ;;  %p1535_p4 = scmp.lt.u32.totalorder %s1744_s3, %s2302_s1 }
  0x1b   : > { %p1532_p3 = pnand %p1531_p2, %p1530_p1  ;;  %p1536_p6 = scmp.lt.u32.totalorder %s1534_s0, %s1529_s8 }
  0x1c   : > { %p1538_p10 = scmp.lt.u32.totalorder %s1529_s8, %s1744_s3 }
  0x1d   : > { %p1533_p5 = pneg %p1532_p3  ;;  %p1537_p7 = por %p1536_p6, %p1535_p4 }
  0x1f   : > { %p1539_p13 = por %p1538_p10, %p1537_p7 }
  0x21   : > { %p1540_p12 = pnand %p1539_p13, %p1533_p5 }
  0x23   : > { %1543 = shalt.err (!%p1540_p12)
}
  0x24   : > { %s1544_s20 = scalar_lea.vmem %s1746_s5, 1024  ;;  %s1643_s21 = smov [#allocation4]  }
  0x25   : > { %p1545_p1 = scmp.ne.s32.totalorder %s1746_s5, %s1544_s20  ;;  %s1549_s26 = sshll.u32 %s1643_s21, 4  ;;  %s1550_s26 = int_to_ptr.vmem [resolvable:$false] %s1549_s26 }
  0x26   : > { %s1551_s27 = scalar_lea.vmem %s1550_s26, 2048  ;;  %p1552_p9 = scmp.lt.s32.totalorder %s1746_s5, %s1550_s26 }
  0x27   : > { %p1547_p3 = pnand %p1545_p1, %p1531_p2  ;;  %p1553_p4 = scmp.lt.s32.totalorder %s1551_s27, %s1544_s20 }
  0x29   : > { %p1548_p11 = pneg %p1547_p3  ;;  %p1554_p6 = por %p1553_p4, %p1552_p9 }
  0x2b   : > { %p1555_p7 = pnand %p1554_p6, %p1548_p11 }
  0x2d   : > { %1558 = shalt.err (!%p1555_p7)
}
  0x2e   : > { %s1644_s28 = smov 1024   ;;  %s1645_s29 = smov 512  }
  0x2f   : > { %s1646_s30 = smov 32   ;;  %p1364_p12 = scmp.ge.s32.totalorder %s1641_s16, 1 }
  0x30   : > { %1430 = dma.hbm_to_vmem [thread:$0]  (!%p1750_p0), %s1744_s3, 1024, %s1746_s5, %s1754_s7, %s1644_s28, %s1645_s29, %s1646_s30  }
  0x31   : > { %p127_p2 = scmp.lt.s32.totalorder %s1641_s16, 3 }
  0x33   : > { %p128_p5 = pnand %p1364_p12, %p127_p2 }
  0x34   : > { %s1785_s4 = sand.u32 (!%p128_p5), 1, %s1625_s12  }
  0x35   : > { %131 = sbr.rel (%p128_p5) target bundleno = 304 (0x130), region = 24  ;;  %s1365_s8 = sshll.u32 (!%p128_p5), %s1785_s4, 6 }
  0x36   : > { %s134_s9 = scalar_lea.sflag (!%p128_p5), [#allocation5], %s1785_s4  ;;  %s1791_s10 = scalar_lea.vmem (!%p128_p5), [#allocation4], %s1365_s8 }
  0x3c   : > { %1612 = dma.done.wait (%p1722_p8), %s134_s9, 1024  }
  0x3d   : > { %1614 = vsyncadd (%p1722_p8), %s134_s9, 4294966272  ;;  %s1367_s3 = sshll.u32 %s1633_s14, 9  ;;  %v163_v0 = vlaneseq  ;;  %s162_s5 = sld [smem:[#allocation3]] }
  0x3e   : > { %v172_v2 = vstv %s1367_s3  ;;  %s2206_s22 = scalar_lea.vmem [#allocation7], %s1365_s8  ;;  %s2248_s19 = scalar_lea.hbm %s2303_s2, %s1367_s3 }
  0x3f   : > { %v170_v1 = vand.u32 127, %v163_v0  ;;  %v164_v13 = vshrl.u32 %v163_v0, 7  ;;  %s1270_s7 = sshll.u32 %s2206_s22, 4  ;;  %s1254_s20 = scalar_lea.sflag [#allocation6], %s1785_s4  ;;  %s2250_s7 = int_to_ptr.vmem [resolvable:$true] %s1270_s7 }
  0x40   : > { %s1559_s21 = scalar_lea.vmem %s2250_s7, 1024  ;;  %p2316_p9 = scmp.ne.s32.totalorder %s2307_s23, 0 }
  0x41   : > { %v171_v3 = vadd.s32 128, %v170_v1  ;;  %v173_v4 = vadd.s32 %v172_v2, %v170_v1  ;;  %v165_v18 = vadd.s32 8, %v164_v13  ;;  %v195_v25 = vmul.u32 2246822519, %v164_v13  ;;  %p1560_p8 = scmp.ne.s32.totalorder %s2250_s7, %s1559_s21  ;;  %s1653_s14 = smov [#allocation7]  }
  0x42   : > { %s1563_s26 = sshll.u32 %s1653_s14, 4  ;;  %s1564_s26 = int_to_ptr.vmem [resolvable:$false] %s1563_s26 }
  0x43   : > { %v174_v5 = vadd.s32 %v172_v2, %v171_v3  ;;  %s175_s6 = smul.u32 2654435761, %s162_s5  ;;  %v196_v26 = vmul.u32 2246822519, %v165_v18  ;;  %p1561_p11 = pnand %p1560_p8, %p2316_p9 }
  0x44   : > { %s1565_s27 = scalar_lea.vmem %s1564_s26, 2048  ;;  %p1566_p10 = scmp.lt.s32.totalorder %s2250_s7, %s1564_s26 }
  0x45   : > { %v176_v6 = vstv %s175_s6  ;;  %p1562_p0 = pneg %p1561_p11  ;;  %p1567_p13 = scmp.lt.s32.totalorder %s1565_s27, %s1559_s21 }
  0x46   : > { %v177_v7 = vadd.s32 %v176_v6, %v173_v4  ;;  %v178_v8 = vadd.s32 %v176_v6, %v174_v5 }
  0x47   : > { %p1568_p1 = por %p1567_p13, %p1566_p10 }
  0x48   : > { %v179_v9 = vshrl.u32 %v177_v7, 16  ;;  %v180_v10 = vshrl.u32 %v178_v8, 16 }
  0x49   : > { %p1569_p3 = pnand %p1568_p1, %p1562_p0 }
  0x4a   : > { %v181_v11 = vxor.u32 %v179_v9, %v177_v7  ;;  %v182_v12 = vxor.u32 %v180_v10, %v178_v8 }
  0x4c   : > { %v183_v14 = vmul.u32 2146121005, %v181_v11  ;;  %v184_v15 = vmul.u32 2146121005, %v182_v12 }
  0x4e   : > { %v185_v16 = vshrl.u32 %v183_v14, 15  ;;  %v186_v17 = vshrl.u32 %v184_v15, 15 }
  0x50   : > { %v187_v19 = vxor.u32 %v185_v16, %v183_v14  ;;  %v188_v20 = vxor.u32 %v186_v17, %v184_v15 }
  0x52   : > { %v189_v21 = vmul.u32 2221713035, %v187_v19  ;;  %v190_v22 = vmul.u32 2221713035, %v188_v20 }
  0x54   : > { %v191_v23 = vshrl.u32 %v189_v21, 16  ;;  %v192_v24 = vshrl.u32 %v190_v22, 16 }
  0x56   : > { %v193_v27 = vxor.u32 %v191_v23, %v189_v21  ;;  %v194_v28 = vxor.u32 %v192_v24, %v190_v22 }
  0x58   : > { %v197_v29 = vxor.u32 %v195_v25, %v193_v27  ;;  %v198_v30 = vxor.u32 %v195_v25, %v194_v28  ;;  %v199_v31 = vxor.u32 %v196_v26, %v193_v27  ;;  %v200_v32 = vxor.u32 %v196_v26, %v194_v28 }
  0x5a   : > { %v201_v33 = vshrl.u32 %v197_v29, 16  ;;  %v202_v34 = vshrl.u32 %v198_v30, 16  ;;  %v203_v35 = vshrl.u32 %v199_v31, 16  ;;  %v204_v36 = vshrl.u32 %v200_v32, 16 }
  0x5c   : > { %v205_v37 = vxor.u32 %v201_v33, %v197_v29  ;;  %v206_v38 = vxor.u32 %v202_v34, %v198_v30  ;;  %v207_v39 = vxor.u32 %v203_v35, %v199_v31  ;;  %v208_v40 = vxor.u32 %v204_v36, %v200_v32 }
  0x5e   : > { %v209_v41 = vmul.u32 2146121005, %v205_v37  ;;  %v210_v42 = vmul.u32 2146121005, %v206_v38 }
  0x5f   : > { %v211_v43 = vmul.u32 2146121005, %v207_v39  ;;  %v212_v44 = vmul.u32 2146121005, %v208_v40 }
  0x60   : > { %v213_v45 = vshrl.u32 %v209_v41, 15  ;;  %v214_v46 = vshrl.u32 %v210_v42, 15 }
  0x61   : > { %v215_v47 = vshrl.u32 %v211_v43, 15  ;;  %v216_v48 = vshrl.u32 %v212_v44, 15 }
  0x62   : > { %v217_v49 = vxor.u32 %v213_v45, %v209_v41  ;;  %v218_v50 = vxor.u32 %v214_v46, %v210_v42 }
  0x63   : > { %v219_v51 = vxor.u32 %v215_v47, %v211_v43  ;;  %v220_v52 = vxor.u32 %v216_v48, %v212_v44 }
  0x64   : > { %v221_v53 = vmul.u32 2221713035, %v217_v49  ;;  %v222_v54 = vmul.u32 2221713035, %v218_v50 }
  0x65   : > { %v223_v55 = vmul.u32 2221713035, %v219_v51  ;;  %v224_v56 = vmul.u32 2221713035, %v220_v52 }
  0x66   : > { %v225_v57 = vshrl.u32 %v221_v53, 16  ;;  %v226_v58 = vshrl.u32 %v222_v54, 16 }
  0x67   : > { %v227_v59 = vshrl.u32 %v223_v55, 16  ;;  %v228_v60 = vshrl.u32 %v224_v56, 16 }
  0x68   : > { %v229_v61 = vxor.u32 %v225_v57, %v221_v53  ;;  %v230_v62 = vxor.u32 %v226_v58, %v222_v54 }
  0x69   : > { %v231_v63 = vxor.u32 %v227_v59, %v223_v55  ;;  %v232_v0 = vxor.u32 %v228_v60, %v224_v56 }
  0x6a   : > { %v233_v1 = vxor.u32 1757159915, %v229_v61  ;;  %v234_v2 = vxor.u32 1757159915, %v230_v62  ;;  %v269_v3 = vxor.u32 48610963, %v229_v61 }
  0x6b   : > { %v235_v4 = vxor.u32 1757159915, %v231_v63  ;;  %v236_v5 = vxor.u32 1757159915, %v232_v0  ;;  %v270_v6 = vxor.u32 48610963, %v230_v62 }
  0x6c   : > { %v237_v7 = vshrl.u32 %v233_v1, 16  ;;  %v238_v8 = vshrl.u32 %v234_v2, 16  ;;  %v271_v9 = vxor.u32 48610963, %v231_v63  ;;  %v272_v10 = vxor.u32 48610963, %v232_v0 }
  0x6d   : > { %v239_v11 = vshrl.u32 %v235_v4, 16  ;;  %v240_v12 = vshrl.u32 %v236_v5, 16  ;;  %v273_v13 = vshrl.u32 %v269_v3, 16  ;;  %v274_v14 = vshrl.u32 %v270_v6, 16 }
  0x6e   : > { %v241_v15 = vxor.u32 %v237_v7, %v233_v1  ;;  %v242_v16 = vxor.u32 %v238_v8, %v234_v2  ;;  %v275_v17 = vshrl.u32 %v271_v9, 16  ;;  %v276_v18 = vshrl.u32 %v272_v10, 16 }
  0x6f   : > { %v243_v19 = vxor.u32 %v239_v11, %v235_v4  ;;  %v244_v20 = vxor.u32 %v240_v12, %v236_v5  ;;  %v277_v21 = vxor.u32 %v273_v13, %v269_v3  ;;  %v278_v22 = vxor.u32 %v274_v14, %v270_v6 }
  0x70   : > { %v245_v23 = vmul.u32 2146121005, %v241_v15  ;;  %v246_v24 = vmul.u32 2146121005, %v242_v16  ;;  %v279_v25 = vxor.u32 %v275_v17, %v271_v9  ;;  %v280_v27 = vxor.u32 %v276_v18, %v272_v10 }
  0x71   : > { %v247_v26 = vmul.u32 2146121005, %v243_v19  ;;  %v281_v30 = vmul.u32 2146121005, %v277_v21 }
  0x72   : > { %v249_v28 = vshrl.u32 %v245_v23, 15  ;;  %v250_v29 = vshrl.u32 %v246_v24, 15  ;;  %v282_v31 = vmul.u32 2146121005, %v278_v22  ;;  %v248_v32 = vmul.u32 2146121005, %v244_v20 }
  0x73   : > { %v283_v33 = vmul.u32 2146121005, %v279_v25  ;;  %v285_v36 = vshrl.u32 %v281_v30, 15  ;;  %v251_v38 = vshrl.u32 %v247_v26, 15  ;;  %v284_v39 = vmul.u32 2146121005, %v280_v27 }
  0x74   : > { %v253_v34 = vxor.u32 %v249_v28, %v245_v23  ;;  %v254_v35 = vxor.u32 %v250_v29, %v246_v24  ;;  %v286_v37 = vshrl.u32 %v282_v31, 15  ;;  %v252_v45 = vshrl.u32 %v248_v32, 15 }
  0x75   : > { %v287_v40 = vshrl.u32 %v283_v33, 15  ;;  %v289_v43 = vxor.u32 %v285_v36, %v281_v30  ;;  %v255_v51 = vxor.u32 %v251_v38, %v247_v26  ;;  %v288_v52 = vshrl.u32 %v284_v39, 15 }
  0x76   : > { %v257_v41 = vmul.u32 2221713035, %v253_v34  ;;  %v258_v42 = vmul.u32 2221713035, %v254_v35  ;;  %v290_v44 = vxor.u32 %v286_v37, %v282_v31  ;;  %v256_v59 = vxor.u32 %v252_v45, %v248_v32 }
  0x77   : > { %v291_v46 = vxor.u32 %v287_v40, %v283_v33  ;;  %v293_v49 = vmul.u32 2221713035, %v289_v43  ;;  %v259_v63 = vmul.u32 2221713035, %v255_v51  ;;  %v292_v0 = vxor.u32 %v288_v52, %v284_v39 }
  0x78   : > { %v261_v47 = vshrl.u32 %v257_v41, 16  ;;  %v262_v48 = vshrl.u32 %v258_v42, 16  ;;  %v294_v50 = vmul.u32 2221713035, %v290_v44  ;;  %v260_v6 = vmul.u32 2221713035, %v256_v59 }
  0x79   : > { %v295_v53 = vmul.u32 2221713035, %v291_v46  ;;  %v297_v56 = vshrl.u32 %v293_v49, 16  ;;  %v263_v9 = vshrl.u32 %v259_v63, 16  ;;  %v296_v10 = vmul.u32 2221713035, %v292_v0 }
  0x7a   : > { %v265_v54 = vxor.u32 %v261_v47, %v257_v41  ;;  %v266_v55 = vxor.u32 %v262_v48, %v258_v42  ;;  %v298_v57 = vshrl.u32 %v294_v50, 16  ;;  %v264_v16 = vshrl.u32 %v260_v6, 16 }
  0x7b   : > { %v299_v58 = vshrl.u32 %v295_v53, 16  ;;  %v301_v60 = vxor.u32 %v297_v56, %v293_v49  ;;  %v267_v19 = vxor.u32 %v263_v9, %v259_v63  ;;  %v300_v20 = vshrl.u32 %v296_v10, 16 }
  0x7c   : > { %v302_v61 = vxor.u32 %v298_v57, %v294_v50  ;;  %v305_v62 = vshrl.u32 %v265_v54, 8  ;;  %v306_v1 = vshrl.u32 %v266_v55, 8  ;;  %v268_v25 = vxor.u32 %v264_v16, %v260_v6 }
  0x7d   : > { %v303_v2 = vxor.u32 %v299_v58, %v295_v53  ;;  %v321_v4 = vshrl.u32 %v301_v60, 8  ;;  %v304_v28 = vxor.u32 %v300_v20, %v296_v10  ;;  %v307_v29 = vshrl.u32 %v267_v19, 8 }
  0x7e   : > { %v309_v3 = vcvt.s32.f32 %v305_v62  ;;  %v322_v5 = vshrl.u32 %v302_v61, 8  ;;  %v310_v11 = vcvt.s32.f32 %v306_v1  ;;  %v308_v35 = vshrl.u32 %v268_v25, 8 }
  0x7f   : > { %v325_v7 = vcvt.s32.f32 %v321_v4  ;;  %v323_v13 = vshrl.u32 %v303_v2, 8  ;;  %v311_v37 = vcvt.s32.f32 %v307_v29  ;;  %v324_v38 = vshrl.u32 %v304_v28, 8 }
  0x80   : > { %v326_v8 = vcvt.s32.f32 %v322_v5  ;;  %v313_v12 = vadd.f32 1.0, %v309_v3  ;;  %v314_v21 = vadd.f32 1.0, %v310_v11  ;;  %v312_v44 = vcvt.s32.f32 %v308_v35 }
  0x81   : > { %v329_v14 = vmul.f32 5.9604645e-08, %v325_v7  ;;  %v327_v23 = vcvt.s32.f32 %v323_v13  ;;  %v315_v46 = vadd.f32 1.0, %v311_v37  ;;  %v328_v47 = vcvt.s32.f32 %v324_v38 }
  0x82   : > { %v330_v15 = vmul.f32 5.9604645e-08, %v326_v8  ;;  %v317_v22 = vmul.f32 5.9604645e-08, %v313_v12  ;;  %v318_v30 = vmul.f32 5.9604645e-08, %v314_v21  ;;  %v316_v55 = vadd.f32 1.0, %v312_v44 }
  0x83   : > { %v1800_v17 = vmul.f32 6.2831855, %v329_v14  ;;  %v331_v31 = vmul.f32 5.9604645e-08, %v327_v23  ;;  %v319_v56 = vmul.f32 5.9604645e-08, %v315_v46  ;;  %v332_v57 = vmul.f32 5.9604645e-08, %v328_v47 }
  0x84   : > { %v1802_v18 = vmul.f32 6.2831855, %v330_v15  ;;  %1497 = vlog2.f32 %v317_v22  ;;  %v1647_v58 = vmov 683565275   ;;  %v1648_v3 = vmov 2475754826  }
  0x85   : > { %v380_v24 = vand.u32 2139095040, %v1800_v17  ;;  %v377_v32 = vand.u32 2147483647, %v1800_v17  ;;  %1499 = vlog2.f32 %v318_v30  ;;  %v1808_v40 = vmul.f32 6.2831855, %v331_v31 }
  0x86   : > { %v483_v27 = vand.u32 2139095040, %v1802_v18  ;;  %v480_v39 = vand.u32 2147483647, %v1802_v18  ;;  %v1649_v7 = vmov 2131351028   ;;  %v1841_v37 = vmul.f32 5.9604645e-08, %v316_v55 }
  0x87   : > { %v381_v26 = vshrl.u32 %v380_v24, 23  ;;  %v384_v41 = vand.u32 8388607, %v377_v32  ;;  %v583_v50 = vand.u32 2147483647, %v1808_v40  ;;  %v586_v51 = vand.u32 2139095040, %v1808_v40 }
  0x88   : > { %v484_v34 = vshrl.u32 %v483_v27, 23  ;;  %v1814_v48 = vand.u32 8388607, %v480_v39  ;;  %v1650_v10 = vmov 2102212464   ;;  %1501 = vlog2.f32 %v319_v56 }
  0x89   : > { %v1368_v33 = vadd.s32 4294967169, %v381_v26  ;;  %v385_v49 = vor.u32 8388608, %v384_v41  ;;  %v587_v63 = vshrl.u32 %v586_v51, 23  ;;  %v1824_v0 = vand.u32 8388607, %v583_v50 }
  0x8a   : > { %v1372_v43 = vadd.s32 4294967169, %v484_v34  ;;  %v488_v60 = vor.u32 8388608, %v1814_v48  ;;  %v1651_v14 = vmov 920167782   ;;  %v1652_v21 = vmov 1326507024  }
  0x8b   : > { %v387_v36 = vadd.s32 1, %v1368_v33  ;;  %v1820_v62 = vshll.u32 %v385_v49, 8  ;;  %v1848_v47 = vmul.f32 6.2831855, %v332_v57 }
  0x8c   : > { %v490_v53 = vadd.s32 1, %v1372_v43  ;;  %v1851_v49 = vshll.u32 %v488_v60, 8 }
  0x8d   : > { %vm388_vm0 = vcmp.gt.s32.totalorder %v387_v36, 0 }
  0x8e   : > { %v389_v42 = vsel %vm388_vm0, %v387_v36, 0  ;;  %v1498_v54 = vpop.eup %1497  ;;  %vm491_vm1 = vcmp.gt.s32.totalorder %v490_v53, 0  ;;  %vm379_vm0 = vcmp.lt.s32.totalorder %v1800_v17, 0 }
  0x8f   : > { %v391_v45 = vand.u32 31, %v389_v42  ;;  %v390_v61 = vshrl.u32 %v389_v42, 5  ;;  %v334_v1 = vmul.f32 0.6931472, %v1498_v54  ;;  %v1500_v5 = vpop.eup %1499  ;;  %v492_v28 = vsel %vm491_vm1, %v490_v53, 0 }
  0x90   : > { %v336_v23 = vmul.f32 0.6931472, %v1500_v5  ;;  %v1376_v42 = vadd.s32 4294967169, %v587_v63  ;;  %v494_v46 = vand.u32 31, %v492_v28  ;;  %v591_v53 = vor.u32 8388608, %v1824_v0 }
  0x91   : > { %v392_v52 = vsub.s32 32, %v391_v45  ;;  %v394_v59 = vshll.u32 %v1647_v58, %v391_v45  ;;  %v397_v6 = vshll.u32 %v1648_v3, %v391_v45  ;;  %v400_v9 = vshll.u32 %v1649_v7, %v391_v45 }
  0x92   : > { %v403_v13 = vshll.u32 %v1650_v10, %v391_v45  ;;  %v406_v16 = vshll.u32 %v1651_v14, %v391_v45  ;;  %vm409_vm2 = vcmp.lt.s32.totalorder %v390_v61, 1  ;;  %vm411_vm3 = vcmp.lt.s32.totalorder %v390_v61, 3 }
  0x93   : > { %v393_v2 = vshrl.u32 %v1647_v58, %v392_v52  ;;  %v395_v4 = vshrl.u32 %v1648_v3, %v392_v52  ;;  %v398_v8 = vshrl.u32 %v1649_v7, %v392_v52  ;;  %v401_v11 = vshrl.u32 %v1650_v10, %v392_v52 }
  0x94   : > { %v404_v15 = vshrl.u32 %v1651_v14, %v392_v52  ;;  %v407_v22 = vshrl.u32 %v1652_v21, %v392_v52  ;;  %vm412_vm4 = vcmp.lt.s32.totalorder %v390_v61, 4  ;;  %v1836_v25 = vmul.f32 -2.0, %v334_v1 }
  0x95   : > { %v396_v12 = vor.u32 %v395_v4, %v394_v59  ;;  %v399_v19 = vor.u32 %v398_v8, %v397_v6  ;;  %v402_v20 = vor.u32 %v401_v11, %v400_v9  ;;  %vm410_vm5 = vcmp.lt.s32.totalorder %v390_v61, 2 }
  0x96   : > { %v405_v24 = vor.u32 %v404_v15, %v403_v13  ;;  %v408_v26 = vor.u32 %v407_v22, %v406_v16  ;;  %v1843_v38 = vmul.f32 -2.0, %v336_v23  ;;  %v493_v45 = vshrl.u32 %v492_v28, 5  ;;  %v1502_v23 = vpop.eup %1501 }
  0x97   : > { %v414_v27 = vsel %vm412_vm4, %v402_v20, 2102212464  ;;  %v417_v29 = vsel %vm409_vm2, %v396_v12, %v399_v19  ;;  %v421_v31 = vsel %vm409_vm2, %v399_v19, %v402_v20  ;;  %v413_v33 = vsel %vm409_vm2, %v393_v2, %v396_v12 }
  0x98   : > { %v418_v30 = vsel %vm412_vm4, %v405_v24, 920167782  ;;  %v415_v34 = vsel %vm411_vm3, %v399_v19, %v414_v27  ;;  %v422_v36 = vsel %vm412_vm4, %v408_v26, 1326507024  ;;  %1503 = vrsqrt.f32 %v1836_v25 }
  0x99   : > { %v419_v35 = vsel %vm411_vm3, %v402_v20, %v418_v30  ;;  %v423_v41 = vsel %vm411_vm3, %v405_v24, %v422_v36  ;;  %v416_v48 = vsel %vm410_vm5, %v413_v33, %v415_v34  ;;  %1505 = vrsqrt.f32 %v1843_v38 }
  0x9a   : > { %v420_v43 = vsel %vm410_vm5, %v417_v29, %v419_v35  ;;  %v424_v44 = vsel %vm410_vm5, %v421_v31, %v423_v41  ;;  %v593_v56 = vadd.s32 1, %v1376_v42  ;;  %v432_v57 = vmul.u32 %v1820_v62, %v416_v48 }
  0x9b   : > { %v1855_v51 = vmul.u32.u64.low %v1820_v62, %v424_v44  ;;  %v1856_v52 = vmul.u32.u64.high %v1820_v62, %v424_v44, %v1855_v51  ;;  %v1861_v54 = vmul.u32.u64.low %v1820_v62, %v420_v43  ;;  %v1862_v55 = vmul.u32.u64.high %v1820_v62, %v420_v43, %v1861_v54 }
  0x9c   : > { %v495_v59 = vsub.s32 32, %v494_v46  ;;  %v497_v60 = vshll.u32 %v1647_v58, %v494_v46  ;;  %vm512_vm6 = vcmp.lt.s32.totalorder %v493_v45, 1  ;;  %v500_v61 = vshll.u32 %v1648_v3, %v494_v46 }
  0x9d   : > { %v503_v63 = vshll.u32 %v1649_v7, %v494_v46  ;;  %v506_v0 = vshll.u32 %v1650_v10, %v494_v46  ;;  %v509_v1 = vshll.u32 %v1651_v14, %v494_v46  ;;  %vm434_vm7 = vc.u32 %v1856_v52, %v1861_v54 }
  0x9e   : > { %v496_v2 = vshrl.u32 %v1647_v58, %v495_v59  ;;  %v498_v4 = vshrl.u32 %v1648_v3, %v495_v59  ;;  %vm513_vm8 = vcmp.lt.s32.totalorder %v493_v45, 2  ;;  %v435_v62 = vadd.s32 1, %v1862_v55 }
  0x9f   : > { %v501_v5 = vshrl.u32 %v1649_v7, %v495_v59  ;;  %v504_v6 = vshrl.u32 %v1650_v10, %v495_v59  ;;  %v507_v8 = vshrl.u32 %v1651_v14, %v495_v59  ;;  %v510_v11 = vshrl.u32 %v1652_v21, %v495_v59 }
  0xa0   : > { %v499_v9 = vor.u32 %v498_v4, %v497_v60  ;;  %vm514_vm9 = vcmp.lt.s32.totalorder %v493_v45, 3  ;;  %vm515_vm10 = vcmp.lt.s32.totalorder %v493_v45, 4  ;;  %v436_v12 = vsel %vm434_vm7, %v435_v62, %v1862_v55 }
  0xa1   : > { %v502_v13 = vor.u32 %v501_v5, %v500_v61  ;;  %v505_v15 = vor.u32 %v504_v6, %v503_v63  ;;  %v508_v16 = vor.u32 %v507_v8, %v506_v0  ;;  %v437_v19 = vadd.s32 %v436_v12, %v432_v57 }
  0xa2   : > { %v511_v20 = vor.u32 %v510_v11, %v509_v1  ;;  %v516_v22 = vsel %vm512_vm6, %v496_v2, %v499_v9  ;;  %vm594_vm11 = vcmp.gt.s32.totalorder %v593_v56, 0  ;;  %v1504_v29 = vpop.eup %1503  ;;  %v338_v55 = vmul.f32 0.6931472, %v1502_v23 }
  0xa3   : > { %v517_v24 = vsel %vm515_vm10, %v505_v15, 2102212464  ;;  %v520_v26 = vsel %vm512_vm6, %v499_v9, %v502_v13  ;;  %v521_v27 = vsel %vm515_vm10, %v508_v16, 920167782  ;;  %v524_v28 = vsel %vm512_vm6, %v502_v13, %v505_v15  ;;  %v1506_v35 = vpop.eup %1505 }
  0xa4   : > { %v438_v30 = vadd.s32 536870912, %v437_v19  ;;  %v518_v31 = vsel %vm514_vm9, %v502_v13, %v517_v24  ;;  %v522_v33 = vsel %vm514_vm9, %v505_v15, %v521_v27  ;;  %v525_v34 = vsel %vm515_vm10, %v511_v20, 1326507024 }
  0xa5   : > { %v519_v36 = vsel %vm513_vm8, %v516_v22, %v518_v31  ;;  %v523_v41 = vsel %vm513_vm8, %v520_v26, %v522_v33  ;;  %v526_v42 = vsel %vm514_vm9, %v508_v16, %v525_v34  ;;  %v595_v43 = vsel %vm594_vm11, %v593_v56, 0 }
  0xa6   : > { %v1892_v44 = vshrl.u32 %v438_v30, 30  ;;  %v527_v46 = vsel %vm513_vm8, %v524_v28, %v526_v42  ;;  %v1896_v48 = vmul.u32.u64.low %v1851_v49, %v523_v41  ;;  %v1897_v51 = vmul.u32.u64.high %v1851_v49, %v523_v41, %v1896_v48 }
  0xa7   : > { %v1901_v57 = vmul.u32.u64.low %v1851_v49, %v527_v46  ;;  %v1902_v59 = vmul.u32.u64.high %v1851_v49, %v527_v46, %v1901_v57  ;;  %1507 = vlog2.f32 %v1841_v37  ;;  %v597_v61 = vand.u32 31, %v595_v43 }
  0xa8   : > { %v440_v60 = vshll.u32 %v1892_v44, 30  ;;  %v686_v56 = vand.u32 2147483647, %v1848_v47  ;;  %v346_v45 = vmul.f32 %v1504_v29, %v1836_v25  ;;  %v535_v63 = vmul.u32 %v1851_v49, %v519_v36 }
  0xa9   : > { %v1909_v0 = vshll.u32 %v591_v53, 8  ;;  %v689_v1 = vand.u32 2139095040, %v1848_v47  ;;  %v538_v4 = vadd.s32 1, %v1897_v51  ;;  %v1915_v62 = vshrl.u32 %v595_v43, 5 }
  0xaa   : > { %v1912_v2 = vsub.s32 %v437_v19, %v440_v60  ;;  %v598_v37 = vsub.s32 32, %v597_v61  ;;  %v1917_v5 = vmul.f32 -2.0, %v338_v55  ;;  %vm347_vm12 = vcmp.eq.f32.partialorder %v1836_v25, inf }
  0xab   : > { %vm537_vm13 = vc.u32 %v1902_v59, %v1896_v48  ;;  %v600_v49 = vshll.u32 %v1647_v58, %v597_v61  ;;  %v350_v53 = vand.u32 2147483648, %v1836_v25  ;;  %v357_v6 = vand.u32 2147483648, %v1843_v38 }
  0xac   : > { %v443_v8 = vsub.s32 0, %v1912_v2  ;;  %v539_v9 = vsel %vm537_vm13, %v538_v4, %v1897_v51  ;;  %v601_v12 = vshrl.u32 %v1648_v3, %v598_v37  ;;  %v603_v13 = vshll.u32 %v1648_v3, %v597_v61 }
  0xad   : > { %v540_v11 = vadd.s32 %v539_v9, %v535_v63  ;;  %v604_v15 = vshrl.u32 %v1649_v7, %v598_v37  ;;  %v1931_v16 = vsel %vm347_vm12, %v1836_v25, %v346_v45  ;;  %v1934_v19 = vmul.f32 %v1506_v35, %v1843_v38 }
  0xae   : > { %v1369_v20 = vmin.u32 %v443_v8, %v1912_v2  ;;  %vm615_vm14 = vcmp.lt.s32.totalorder %v1915_v62, 1  ;;  %v602_v23 = vor.u32 %v601_v12, %v600_v49  ;;  %v606_v24 = vshll.u32 %v1649_v7, %v597_v61 }
  0xaf   : > { %v541_v22 = vadd.s32 536870912, %v540_v11  ;;  %vm618_vm15 = vcmp.lt.s32.totalorder %v1915_v62, 4  ;;  %v607_v27 = vshrl.u32 %v1650_v10, %v598_v37  ;;  %v609_v28 = vshll.u32 %v1650_v10, %v597_v61 }
  0xb0   : > { %v445_v26 = vclz %v1369_v20  ;;  %v610_v29 = vshrl.u32 %v1651_v14, %v598_v37  ;;  %v605_v31 = vor.u32 %v604_v15, %v603_v13  ;;  %v612_v33 = vshll.u32 %v1651_v14, %v597_v61 }
  0xb1   : > { %v1944_v30 = vshrl.u32 %v541_v22, 30  ;;  %v613_v34 = vshrl.u32 %v1652_v21, %v598_v37  ;;  %v1948_v35 = vpop.eup %1507  ;;  %vm349_vm1 = vcmp.eq.f32.partialorder %v1836_v25, 0.0  ;;  %v599_v41 = vshrl.u32 %v1647_v58, %v598_v37 }
  0xb2   : > { %v1370_v36 = vadd.s32 4294967294, %v445_v26  ;;  %v608_v42 = vor.u32 %v607_v27, %v606_v24  ;;  %v611_v43 = vor.u32 %v610_v29, %v609_v28  ;;  %vm354_vm2 = vcmp.eq.f32.partialorder %v1843_v38, inf }
  0xb3   : > { %v433_v46 = vadd.s32 %v1861_v54, %v1856_v52  ;;  %v463_v51 = vsub.s32 4, %v1892_v44  ;;  %v543_v55 = vshll.u32 %v1944_v30, 30  ;;  %vm617_vm3 = vcmp.lt.s32.totalorder %v1915_v62, 3 }
  0xb4   : > { %vm1371_vm4 = vcmp.lt.s32.totalorder %v1370_v36, 0  ;;  %v614_v57 = vor.u32 %v613_v34, %v612_v33  ;;  %v620_v60 = vsel %vm618_vm15, %v608_v42, 2102212464  ;;  %v624_v61 = vsel %vm618_vm15, %v611_v43, 920167782 }
  0xb5   : > { %vm1964_vm5 = vcmp.le.f32.partialorder %v377_v32, 0.7853982  ;;  %v448_v52 = vsel %vm1371_vm4, 0, %v1370_v36  ;;  %v1968_v54 = vsub.s32 %v540_v11, %v543_v55  ;;  %vm616_vm6 = vcmp.lt.s32.totalorder %v1915_v62, 2 }
  0xb6   : > { %v623_v63 = vsel %vm615_vm14, %v602_v23, %v605_v31  ;;  %v449_v4 = vsub.s32 32, %v448_v52  ;;  %v450_v37 = vshll.u32 %v1912_v2, %v448_v52  ;;  %v453_v49 = vsub.s32 4294967266, %v448_v52 }
  0xb7   : > { %v619_v8 = vsel %vm615_vm14, %v599_v41, %v602_v23  ;;  %vm482_vm7 = vcmp.lt.s32.totalorder %v1802_v18, 0  ;;  %v546_v32 = vsub.s32 0, %v1968_v54  ;;  %v621_v9 = vsel %vm617_vm3, %v605_v31, %v620_v60 }
  0xb8   : > { %v625_v11 = vsel %vm617_vm3, %v608_v42, %v624_v61  ;;  %v627_v12 = vsel %vm615_vm14, %v605_v31, %v608_v42  ;;  %v451_v13 = vshrl.u32 %v433_v46, %v449_v4  ;;  %v454_v15 = vadd.s32 127, %v453_v49 }
  0xb9   : > { %v626_v2 = vsel %vm616_vm6, %v623_v63, %v625_v11  ;;  %v628_v20 = vsel %vm618_vm15, %v614_v57, 1326507024  ;;  %v464_v22 = vsel %vm379_vm0, %v463_v51, %v1892_v44  ;;  %v1373_v23 = vmin.u32 %v546_v32, %v1968_v54 }
  0xba   : > { %v566_v24 = vsub.s32 4, %v1944_v30  ;;  %v690_v26 = vshrl.u32 %v689_v1, 23  ;;  %v452_v27 = vor.u32 %v451_v13, %v450_v37  ;;  %v455_v28 = vshll.u32 %v454_v15, 23 }
  0xbb   : > { %v622_v29 = vsel %vm616_vm6, %v619_v8, %v621_v9  ;;  %v629_v31 = vsel %vm617_vm3, %v611_v43, %v628_v20  ;;  %vm2001_vm8 = vcmp.le.f32.partialorder %v480_v39, 0.7853982  ;;  %v548_v44 = vclz %v1373_v23 }
  0xbc   : > { %v630_v34 = vsel %vm616_vm6, %v627_v12, %v629_v31  ;;  %v2008_v1 = vmul.u32.u64.low %v1909_v0, %v626_v2  ;;  %v2009_v36 = vmul.u32.u64.high %v1909_v0, %v626_v2, %v2008_v1  ;;  %v456_v41 = vor.u32 4788187, %v455_v28 }
  0xbd   : > { %v459_v42 = vcvt.s32.f32 %v452_v27  ;;  %v2012_v46 = vmul.u32.u64.low %v1909_v0, %v630_v34  ;;  %v2013_v51 = vmul.u32.u64.high %v1909_v0, %v630_v34, %v2012_v46  ;;  %v2020_v39 = vsel %vm349_vm1, %v350_v53, %v1931_v16 }
  0xbe   : > { %1509 = vrsqrt.f32 %v1917_v5  ;;  %v1374_v62 = vadd.s32 4294967294, %v548_v44  ;;  %v1380_v43 = vadd.s32 4294967169, %v690_v26  ;;  %v2027_v55 = vsel %vm354_vm2, %v1843_v38, %v1934_v19 }
  0xbf   : > { %v457_v57 = vand.u32 2147483647, %v456_v41  ;;  %v466_v60 = vsel %vm1964_vm5, 0, %v464_v22  ;;  %v638_v61 = vmul.u32 %v1909_v0, %v622_v29  ;;  %v536_v25 = vadd.s32 %v1896_v48, %v1902_v59 }
  0xc0   : > { %vm1375_vm9 = vcmp.lt.s32.totalorder %v1374_v62, 0  ;;  %v641_v53 = vadd.s32 1, %v2009_v36  ;;  %v696_v16 = vadd.s32 1, %v1380_v43  ;;  %v567_v19 = vsel %vm482_vm7, %v566_v24, %v1944_v30 }
  0xc1   : > { %v460_v52 = vmul.f32 %v459_v42, %v457_v57  ;;  %v551_v63 = vsel %vm1375_vm9, 0, %v1374_v62  ;;  %vm640_vm10 = vc.u32 %v2013_v51, %v2008_v1  ;;  %v2041_v48 = vand.u32 3, %v466_v60 }
  0xc2   : > { %v552_v4 = vsub.s32 32, %v551_v63  ;;  %v553_v37 = vshll.u32 %v1968_v54, %v551_v63  ;;  %v556_v49 = vsub.s32 4294967266, %v551_v63  ;;  %v642_v0 = vsel %vm640_vm10, %v641_v53, %v2009_v36 }
  0xc3   : > { %v461_v8 = vxor.u32 2147483648, %v460_v52  ;;  %v643_v59 = vadd.s32 %v642_v0, %v638_v61  ;;  %vm697_vm11 = vcmp.gt.s32.totalorder %v696_v16, 0  ;;  %v693_v11 = vand.u32 8388607, %v686_v56 }
  0xc4   : > { %v554_v32 = vshrl.u32 %v536_v25, %v552_v4  ;;  %v557_v9 = vadd.s32 127, %v556_v49  ;;  %v698_v12 = vsel %vm697_vm11, %v696_v16, 0  ;;  %v569_v54 = vsel %vm2001_vm8, 0, %v567_v19 }
  0xc5   : > { %v462_v30 = vsel %vm379_vm0, %v461_v8, %v460_v52  ;;  %v644_v13 = vadd.s32 536870912, %v643_v59  ;;  %v700_v15 = vand.u32 31, %v698_v12  ;;  %v2052_v23 = vand.u32 3, %v569_v54 }
  0xc6   : > { %v465_v2 = vsel %vm1964_vm5, %v1800_v17, %v462_v30  ;;  %v555_v20 = vor.u32 %v554_v32, %v553_v37  ;;  %v558_v22 = vshll.u32 %v557_v9, 23  ;;  %v886_v27 = vadd.s32 3, %v466_v60 }
  0xc7   : > { %1511 = vcosq.f32 %v465_v2  ;;  %v2054_v24 = vshrl.u32 %v644_v13, 30  ;;  %v701_v26 = vsub.s32 32, %v700_v15  ;;  %v694_v44 = vor.u32 8388608, %v693_v11 }
  0xc8   : > { %v2056_v28 = vpop.eup %1509  ;;  %1513 = vsinq.f32 %v465_v2  ;;  %v559_v29 = vor.u32 4788187, %v558_v22  ;;  %v562_v31 = vcvt.s32.f32 %v555_v20  ;;  %vm475_vm12 = vcmp.eq.s32.totalorder %v2041_v48, 2 }
  0xc9   : > { %v2060_v45 = vadd.s32 %v2008_v1, %v2013_v51  ;;  %v646_v34 = vshll.u32 %v2054_v24, 30  ;;  %v2063_v36 = vshrl.u32 %v698_v12, 5  ;;  %v2065_v41 = vadd.s32 3, %v569_v54 }
  0xca   : > { %vm472_vm13 = vcmp.eq.s32.totalorder %v2041_v48, 0  ;;  %v560_v42 = vand.u32 2147483647, %v559_v29  ;;  %v703_v46 = vshll.u32 %v1647_v58, %v700_v15  ;;  %v704_v62 = vshrl.u32 %v1648_v3, %v701_v26 }
  0xcb   : > { %v706_v43 = vshll.u32 %v1648_v3, %v700_v15  ;;  %vm471_vm14 = vcmp.lt.s32.totalorder %v2041_v48, 2  ;;  %v2072_v57 = vsub.s32 %v643_v59, %v646_v34  ;;  %v707_v1 = vshrl.u32 %v1649_v7, %v701_v26 }
  0xcc   : > { %v709_v51 = vshll.u32 %v1649_v7, %v700_v15  ;;  %v710_v60 = vshrl.u32 %v1650_v10, %v701_v26  ;;  %v563_v61 = vmul.f32 %v562_v31, %v560_v42  ;;  %v712_v25 = vshll.u32 %v1650_v10, %v700_v15 }
  0xcd   : > { %v2078_v53 = vshll.u32 %v694_v44, 8  ;;  %v2080_v16 = vand.u32 3, %v886_v27  ;;  %vm469_vm15 = vweird.f32 %v1800_v17  ;;  %v649_v3 = vsub.s32 0, %v2072_v57 }
  0xce   : > { %v669_v52 = vsub.s32 4, %v2054_v24  ;;  %v713_v63 = vshrl.u32 %v1651_v14, %v701_v26  ;;  %v715_v19 = vshll.u32 %v1651_v14, %v700_v15  ;;  %v564_v7 = vxor.u32 2147483648, %v563_v61 }
  0xcf   : > { %v702_v4 = vshrl.u32 %v1647_v58, %v701_v26  ;;  %v705_v37 = vor.u32 %v704_v62, %v703_v46  ;;  %v716_v10 = vshrl.u32 %v1652_v21, %v701_v26  ;;  %v1377_v49 = vmin.u32 %v649_v3, %v2072_v57 }
  0xd0   : > { %v708_v0 = vor.u32 %v707_v1, %v706_v43  ;;  %v711_v8 = vor.u32 %v710_v60, %v709_v51  ;;  %vm718_vm0 = vcmp.lt.s32.totalorder %v2063_v36, 1  ;;  %v565_v59 = vsel %vm482_vm7, %v564_v7, %v563_v61 }
  0xd1   : > { %v714_v32 = vor.u32 %v713_v63, %v712_v25  ;;  %v717_v9 = vor.u32 %v716_v10, %v715_v19  ;;  %vm719_vm1 = vcmp.lt.s32.totalorder %v2063_v36, 2  ;;  %v1512_v14 = vpop.eup %1511  ;;  %v568_v58 = vsel %vm2001_vm8, %v1802_v18, %v565_v59 }
  0xd2   : > { %v651_v11 = vclz %v1377_v49  ;;  %vm720_vm2 = vcmp.lt.s32.totalorder %v2063_v36, 3  ;;  %vm721_vm3 = vcmp.lt.s32.totalorder %v2063_v36, 4  ;;  %vm888_vm4 = vcmp.lt.s32.totalorder %v2080_v16, 2  ;;  %v1514_v21 = vpop.eup %1513 }
  0xd3   : > { %v476_v12 = vxor.u32 2147483648, %v1512_v14  ;;  %1515 = vcosq.f32 %v568_v58  ;;  %v722_v30 = vsel %vm718_vm0, %v702_v4, %v705_v37  ;;  %v723_v54 = vsel %vm721_vm3, %v711_v8, 2102212464 }
  0xd4   : > { %v473_v13 = vxor.u32 2147483648, %v1514_v21  ;;  %1517 = vsinq.f32 %v568_v58  ;;  %v1378_v33 = vadd.s32 4294967294, %v651_v11  ;;  %v726_v15 = vsel %vm718_vm0, %v705_v37, %v708_v0 }
  0xd5   : > { %v477_v2 = vsel %vm475_vm12, %v476_v12, %v1514_v21  ;;  %vm578_vm5 = vcmp.eq.s32.totalorder %v2052_v23, 2  ;;  %v724_v20 = vsel %vm720_vm2, %v708_v0, %v723_v54  ;;  %v727_v22 = vsel %vm721_vm3, %v714_v32, 920167782 }
  0xd6   : > { %v730_v26 = vsel %vm718_vm0, %v708_v0, %v711_v8  ;;  %vm356_vm6 = vcmp.eq.f32.partialorder %v1843_v38, 0.0  ;;  %v474_v27 = vsel %vm472_vm13, %v1512_v14, %v473_v13  ;;  %vm575_vm7 = vcmp.eq.s32.totalorder %v2052_v23, 0 }
  0xd7   : > { %vm1379_vm8 = vcmp.lt.s32.totalorder %v1378_v33, 0  ;;  %v728_v29 = vsel %vm720_vm2, %v711_v8, %v727_v22  ;;  %v731_v31 = vsel %vm721_vm3, %v717_v9, 1326507024  ;;  %v478_v44 = vsel %vm471_vm14, %v474_v27, %v477_v2 }
  0xd8   : > { %vm574_vm9 = vcmp.lt.s32.totalorder %v2052_v23, 2  ;;  %v654_v34 = vsel %vm1379_vm8, 0, %v1378_v33  ;;  %v729_v42 = vsel %vm719_vm1, %v726_v15, %v728_v29  ;;  %v732_v46 = vsel %vm720_vm2, %v714_v32, %v731_v31  ;;  %v1213_v31 = vld [vmem:[%s1791_s10] sm:$0xff] }
  0xd9   : > { %vm572_vm10 = vweird.f32 %v1802_v18  ;;  %v655_v62 = vsub.s32 32, %v654_v34  ;;  %v656_v43 = vshll.u32 %v2072_v57, %v654_v34  ;;  %v659_v1 = vsub.s32 4294967266, %v654_v34 }
  0xda   : > { %v725_v51 = vsel %vm719_vm1, %v722_v30, %v724_v20  ;;  %v479_v48 = vsel %vm469_vm15, nan, %v478_v44  ;;  %v733_v60 = vsel %vm719_vm1, %v730_v26, %v732_v46  ;;  %vm585_vm11 = vcmp.lt.s32.totalorder %v1808_v40, 0 }
  0xdb   : > { %v2139_v61 = vmul.u32.u64.low %v2078_v53, %v729_v42  ;;  %v2140_v25 = vmul.u32.u64.high %v2078_v53, %v729_v42, %v2139_v61  ;;  %v657_v3 = vshrl.u32 %v2060_v45, %v655_v62  ;;  %v660_v57 = vadd.s32 127, %v659_v1  ;;  %v1214_v62 = vld [vmem:[%s1791_s10 + $0x8] sm:$0xff]  ;;  %v1216_v1 = vld [vmem:[%s1791_s10 + $0x18] sm:$0xff] }
  0xdc   : > { %v2146_v63 = vmul.u32.u64.low %v2078_v53, %v733_v60  ;;  %v2147_v19 = vmul.u32.u64.high %v2078_v53, %v733_v60, %v2146_v63  ;;  %v741_v7 = vmul.u32 %v2078_v53, %v725_v51  ;;  %vm889_vm12 = vcmp.eq.s32.totalorder %v2080_v16, 0 }
  0xdd   : > { %vm892_vm13 = vcmp.eq.s32.totalorder %v2080_v16, 2  ;;  %v991_v36 = vand.u32 3, %v2065_v41  ;;  %vm2155_vm14 = vcmp.le.f32.partialorder %v583_v50, 0.7853982  ;;  %v658_v45 = vor.u32 %v657_v3, %v656_v43  ;;  %v1516_v0 = vpop.eup %1515  ;;  %v1215_v43 = vld [vmem:[%s1791_s10 + $0x10] sm:$0xff] }
  0xde   : > { %v661_v37 = vshll.u32 %v660_v57, 23  ;;  %v891_v10 = vsel %vm889_vm12, %v1512_v14, %v473_v13  ;;  %v894_v49 = vsel %vm892_vm13, %v476_v12, %v1514_v21  ;;  %v744_v8 = vadd.s32 1, %v2140_v25  ;;  %v1518_v41 = vpop.eup %1517 }
  0xdf   : > { %v789_v53 = vmul.f32 %v479_v48, %v2020_v39  ;;  %v895_v59 = vsel %vm888_vm4, %v891_v10, %v894_v49  ;;  %vm992_vm0 = vcmp.lt.s32.totalorder %v991_v36, 2  ;;  %v579_v32 = vxor.u32 2147483648, %v1516_v0 }
  0xe0   : > { %v662_v9 = vor.u32 4788187, %v661_v37  ;;  %v665_v50 = vcvt.s32.f32 %v658_v45  ;;  %vm993_vm1 = vcmp.eq.s32.totalorder %v991_v36, 0  ;;  %v576_v58 = vxor.u32 2147483648, %v1518_v41 }
  0xe1   : > { %vm743_vm2 = vc.u32 %v2147_v19, %v2139_v61  ;;  %v896_v14 = vsel %vm469_vm15, nan, %v895_v59  ;;  %vm996_vm3 = vcmp.eq.s32.totalorder %v991_v36, 2  ;;  %v580_v11 = vsel %vm578_vm5, %v579_v32, %v1518_v41 }
  0xe2   : > { %v663_v21 = vand.u32 2147483647, %v662_v9  ;;  %v745_v16 = vsel %vm743_vm2, %v744_v8, %v2140_v25  ;;  %v998_v12 = vsel %vm996_vm3, %v579_v32, %v1518_v41  ;;  %v358_v30 = vsel %vm356_vm6, %v357_v6, %v2027_v55 }
  0xe3   : > { %v577_v54 = vsel %vm575_vm7, %v1516_v0, %v576_v58  ;;  %v746_v17 = vadd.s32 %v745_v16, %v741_v7  ;;  %v995_v13 = vsel %vm993_vm1, %v1516_v0, %v576_v58  ;;  %v1209_v20 = vmul.f32 %v896_v14, %v2020_v39 }
  0xe4   : > { %v581_v33 = vsel %vm574_vm9, %v577_v54, %v580_v11  ;;  %v666_v15 = vmul.f32 %v665_v50, %v663_v21  ;;  %v999_v2 = vsel %vm992_vm0, %v995_v13, %v998_v12  ;;  %v670_v38 = vsel %vm585_vm11, %v669_v52, %v2054_v24 }
  0xe5   : > { %v582_v22 = vsel %vm572_vm10, nan, %v581_v33  ;;  %v747_v6 = vadd.s32 536870912, %v746_v17  ;;  %v1000_v55 = vsel %vm572_vm10, nan, %v999_v2  ;;  %v1221_v39 = vmul.f32 0.1, %v789_v53 }
  0xe6   : > { %v667_v23 = vxor.u32 2147483648, %v666_v15  ;;  %v790_v26 = vmul.f32 %v582_v22, %v358_v30  ;;  %v1210_v27 = vmul.f32 %v1000_v55, %v358_v30  ;;  %v1223_v42 = vmul.f32 0.1, %v1209_v20 }
  0xe7   : > { %v2190_v29 = vshrl.u32 %v747_v6, 30  ;;  %v672_v52 = vsel %vm2155_vm14, 0, %v670_v38  ;;  %v1229_v51 = vadd.f32 1.0, %v1221_v39  ;;  %v360_v10 = vmul.f32 %v2056_v28, %v1917_v5 }
  0xe8   : > { %v668_v44 = vsel %vm585_vm11, %v667_v23, %v666_v15  ;;  %v1222_v34 = vmul.f32 0.1, %v790_v26  ;;  %v1224_v24 = vmul.f32 0.1, %v1210_v27  ;;  %v1231_v60 = vadd.f32 1.0, %v1223_v42 }
  0xe9   : > { %v671_v18 = vsel %vm2155_vm14, %v1808_v40, %v668_v44  ;;  %v749_v46 = vshll.u32 %v2190_v29, 30  ;;  %v1237_v57 = vmul.f32 %v1229_v51, %v1213_v31  ;;  %v1094_v4 = vadd.s32 3, %v672_v52  ;;  %v1217_v31 = vld [vmem:[%s1791_s10 + $0x20] sm:$0xff]  ;;  %v1219_v44 = vld [vmem:[%s1791_s10 + $0x30] sm:$0xff] }
  0xea   : > { %1519 = vcosq.f32 %v671_v18  ;;  %v1230_v48 = vadd.f32 1.0, %v1222_v34  ;;  %v1232_v25 = vadd.f32 1.0, %v1224_v24  ;;  %v1239_v7 = vmul.f32 %v1231_v60, %v1215_v43 }
  0xeb   : > { %1521 = vsinq.f32 %v671_v18  ;;  %v750_v3 = vsub.s32 %v746_v17, %v749_v46  ;;  %1245 = vst [vmem:[%s2206_s22] sm:$0xff] %v1237_v57  ;;  %v676_v49 = vand.u32 3, %v672_v52  ;;  %vm361_vm15 = vcmp.eq.f32.partialorder %v1917_v5, inf }
  0xec   : > { %v1238_v63 = vmul.f32 %v1230_v48, %v1214_v62  ;;  %v1240_v36 = vmul.f32 %v1232_v25, %v1216_v1  ;;  %1247 = vst [vmem:[%s2206_s22 + $0x10] sm:$0xff] %v1239_v7  ;;  %v1095_v8 = vand.u32 3, %v1094_v4  ;;  %vm675_vm4 = vweird.f32 %v1808_v40 }
  0xed   : > { %v752_v45 = vsub.s32 0, %v750_v3  ;;  %v340_v53 = vmul.f32 0.6931472, %v1948_v35  ;;  %vm363_vm5 = vcmp.eq.f32.partialorder %v1917_v5, 0.0  ;;  %v364_v59 = vand.u32 2147483648, %v1917_v5 }
  0xee   : > { %1246 = vst [vmem:[%s2206_s22 + $0x8] sm:$0xff] %v1238_v63  ;;  %1248 = vst [vmem:[%s2206_s22 + $0x18] sm:$0xff] %v1240_v36  ;;  %v362_v9 = vsel %vm361_vm15, %v1917_v5, %v360_v10  ;;  %vm678_vm6 = vcmp.eq.s32.totalorder %v676_v49, 0  ;;  %vm681_vm7 = vcmp.eq.s32.totalorder %v676_v49, 2  ;;  %v742_v28 = vadd.s32 %v2139_v61, %v2147_v19 }
  0xef   : > { %v1381_v37 = vmin.u32 %v752_v45, %v750_v3  ;;  %vm1097_vm9 = vcmp.eq.s32.totalorder %v1095_v8, 0  ;;  %vm1100_vm10 = vcmp.eq.s32.totalorder %v1095_v8, 2  ;;  %vm677_vm11 = vcmp.lt.s32.totalorder %v676_v49, 2 }
  0xf0   : > { %vm1096_vm12 = vcmp.lt.s32.totalorder %v1095_v8, 2  ;;  %v365_v30 = vsel %vm363_vm5, %v364_v59, %v362_v9  ;;  %v344_v55 = vmul.f32 -2.0, %v340_v53  ;;  %v772_v42 = vsub.s32 4, %v2190_v29 }
  0xf1   : > { %v754_v0 = vclz %v1381_v37  ;;  %vm688_vm13 = vcmp.lt.s32.totalorder %v1848_v47, 0  ;;  %vm687_vm14 = vcmp.le.f32.partialorder %v686_v56, 0.7853982 }
  0xf2   : > { %1523 = vrsqrt.f32 %v344_v55  ;;  %v773_v43 = vsel %vm688_vm13, %v772_v42, %v2190_v29  ;;  %vm368_vm0 = vcmp.eq.f32.partialorder %v344_v55, inf  ;;  %vm370_vm1 = vcmp.eq.f32.partialorder %v344_v55, 0.0 }
  0xf3   : > { %v1382_v41 = vadd.s32 4294967294, %v754_v0  ;;  %v775_v48 = vsel %vm687_vm14, 0, %v773_v43  ;;  %v371_v56 = vand.u32 2147483648, %v344_v55 }
  0xf4   : > { %v1520_v32 = vpop.eup %1519  ;;  %v1198_v60 = vadd.s32 3, %v775_v48 }
  0xf5   : > { %v1522_v50 = vpop.eup %1521  ;;  %v682_v58 = vxor.u32 2147483648, %v1520_v32  ;;  %vm1383_vm8 = vcmp.lt.s32.totalorder %v1382_v41, 0 }
  0xf6   : > { %v679_v35 = vxor.u32 2147483648, %v1522_v50  ;;  %v757_v14 = vsel %vm1383_vm8, 0, %v1382_v41  ;;  %v1199_v57 = vand.u32 3, %v1198_v60 }
  0xf7   : > { %v683_v11 = vsel %vm681_vm7, %v682_v58, %v1522_v50  ;;  %v758_v21 = vsub.s32 32, %v757_v14  ;;  %v759_v16 = vshll.u32 %v750_v3, %v757_v14  ;;  %v762_v12 = vsub.s32 4294967266, %v757_v14 }
  0xf8   : > { %v680_v54 = vsel %vm678_vm6, %v1520_v32, %v679_v35  ;;  %v1099_v17 = vsel %vm1097_vm9, %v1520_v32, %v679_v35  ;;  %v1102_v61 = vsel %vm1100_vm10, %v682_v58, %v1522_v50  ;;  %v779_v3 = vand.u32 3, %v775_v48  ;;  %v1220_v35 = vld [vmem:[%s1791_s10 + $0x38] sm:$0xff] }
  0xf9   : > { %v684_v19 = vsel %vm677_vm11, %v680_v54, %v683_v11  ;;  %v760_v13 = vshrl.u32 %v742_v28, %v758_v21  ;;  %v763_v33 = vadd.s32 127, %v762_v12  ;;  %v1103_v15 = vsel %vm1096_vm12, %v1099_v17, %v1102_v61 }
  0xfa   : > { %v685_v2 = vsel %vm675_vm4, nan, %v684_v19  ;;  %v1104_v20 = vsel %vm675_vm4, nan, %v1103_v15  ;;  %vm784_vm2 = vcmp.eq.s32.totalorder %v779_v3, 2  ;;  %vm1204_vm3 = vcmp.eq.s32.totalorder %v1199_v57, 2 }
  0xfb   : > { %v761_v22 = vor.u32 %v760_v13, %v759_v16  ;;  %v764_v38 = vshll.u32 %v763_v33, 23  ;;  %v791_v5 = vmul.f32 %v685_v2, %v365_v30  ;;  %v1211_v6 = vmul.f32 %v1104_v20, %v365_v30 }
  0xfc   : > { %v1524_v25 = vpop.eup %1523  ;;  %vm781_vm15 = vcmp.eq.s32.totalorder %v779_v3, 0  ;;  %vm1201_vm4 = vcmp.eq.s32.totalorder %v1199_v57, 0  ;;  %vm780_vm5 = vcmp.lt.s32.totalorder %v779_v3, 2  ;;  %vm1200_vm6 = vcmp.lt.s32.totalorder %v1199_v57, 2 }
  0xfd   : > { %v765_v23 = vor.u32 4788187, %v764_v38  ;;  %v768_v26 = vcvt.s32.f32 %v761_v22  ;;  %v1225_v27 = vmul.f32 0.1, %v791_v5  ;;  %v1227_v39 = vmul.f32 0.1, %v1211_v6 }
  0xfe   : > { %v367_v63 = vmul.f32 %v1524_v25, %v344_v55  ;;  %vm778_vm7 = vweird.f32 %v1848_v47 }
  0xff   : > { %v766_v34 = vand.u32 2147483647, %v765_v23  ;;  %v1233_v24 = vadd.f32 1.0, %v1225_v27  ;;  %v1235_v18 = vadd.f32 1.0, %v1227_v39 }
 0x100   : > { %v369_v36 = vsel %vm368_vm0, %v344_v55, %v367_v63 }
 0x101   : > { %v769_v40 = vmul.f32 %v768_v26, %v766_v34  ;;  %v1241_v52 = vmul.f32 %v1233_v24, %v1217_v31  ;;  %v1243_v46 = vmul.f32 %v1235_v18, %v1219_v44  ;;  %v372_v49 = vsel %vm370_vm1, %v371_v56, %v369_v36 }
 0x103   : > { %v770_v62 = vxor.u32 2147483648, %v769_v40  ;;  %1249 = vst [vmem:[%s2206_s22 + $0x20] sm:$0xff] %v1241_v52  ;;  %1251 = vst [vmem:[%s2206_s22 + $0x30] sm:$0xff] %v1243_v46 }
 0x105   : > { %v771_v1 = vsel %vm688_vm13, %v770_v62, %v769_v40 }
 0x106   : > { %v774_v51 = vsel %vm687_vm14, %v1848_v47, %v771_v1  ;;  %v1218_v47 = vld [vmem:[%s1791_s10 + $0x28] sm:$0xff] }
 0x107   : > { %1525 = vcosq.f32 %v774_v51 }
 0x108   : > { %1527 = vsinq.f32 %v774_v51 }
 0x111   : > { %v1526_v7 = vpop.eup %1525 }
 0x112   : > { %v1528_v29 = vpop.eup %1527  ;;  %v785_v45 = vxor.u32 2147483648, %v1526_v7 }
 0x113   : > { %v782_v4 = vxor.u32 2147483648, %v1528_v29 }
 0x114   : > { %v786_v37 = vsel %vm784_vm2, %v785_v45, %v1528_v29  ;;  %v1206_v10 = vsel %vm1204_vm3, %v785_v45, %v1528_v29 }
 0x115   : > { %v783_v0 = vsel %vm781_vm15, %v1526_v7, %v782_v4  ;;  %v1203_v8 = vsel %vm1201_vm4, %v1526_v7, %v782_v4 }
 0x116   : > { %v787_v53 = vsel %vm780_vm5, %v783_v0, %v786_v37  ;;  %v1207_v59 = vsel %vm1200_vm6, %v1203_v8, %v1206_v10 }
 0x117   : > { %v788_v41 = vsel %vm778_vm7, nan, %v787_v53  ;;  %v1208_v32 = vsel %vm778_vm7, nan, %v1207_v59 }
 0x118   : > { %v792_v9 = vmul.f32 %v788_v41, %v372_v49  ;;  %v1212_v28 = vmul.f32 %v1208_v32, %v372_v49 }
 0x11a   : > { %v1226_v50 = vmul.f32 0.1, %v792_v9  ;;  %v1228_v58 = vmul.f32 0.1, %v1212_v28 }
 0x11c   : > { %v1234_v14 = vadd.f32 1.0, %v1226_v50  ;;  %v1236_v11 = vadd.f32 1.0, %v1228_v58 }
 0x11e   : > { %v1242_v21 = vmul.f32 %v1234_v14, %v1218_v47  ;;  %v1244_v16 = vmul.f32 %v1236_v11, %v1220_v35 }
 0x120   : > { %1250 = vst [vmem:[%s2206_s22 + $0x28] sm:$0xff] %v1242_v21  ;;  %1252 = vst [vmem:[%s2206_s22 + $0x38] sm:$0xff] %v1244_v16 }
 0x121   : > { %1572 = shalt.err (!%p1569_p3)
}
 0x122   : > { %s1573_s28 = scalar_lea.hbm %s2248_s19, 1024  ;;  %s1577_s8 = scalar_lea.hbm %s2303_s2, 2048 }
 0x123   : > { %p1574_p4 = scmp.ne.s32.totalorder %s2248_s19, %s1573_s28  ;;  %p1578_p12 = scmp.lt.u32.totalorder %s2248_s19, %s2303_s2 }
 0x124   : > { %p1579_p2 = scmp.lt.u32.totalorder %s1577_s8, %s1573_s28  ;;  %p1581_p8 = scmp.lt.u32.totalorder %s1573_s28, %s2248_s19 }
 0x125   : > { %p1575_p6 = pnand %p1574_p4, %p2316_p9 }
 0x126   : > { %p1580_p5 = por %p1579_p2, %p1578_p12 }
 0x127   : > { %p1576_p7 = pneg %p1575_p6 }
 0x128   : > { %p1582_p11 = por %p1581_p8, %p1580_p5 }
 0x12a   : > { %p1583_p0 = pnand %p1582_p11, %p1576_p7 }
 0x12c   : > { %1586 = shalt.err (!%p1583_p0)
}
 0x12d   : > { %s1654_s3 = smov 512   ;;  %s1655_s5 = smov 1024  }
 0x12e   : > { %s1656_s6 = smov 32  }
 0x12f   : > { %1425 = dma.vmem_to_hbm [thread:$0]  (%p2316_p9), %s2250_s7, 1024, %s2248_s19, %s1254_s20, %s1654_s3, %s1655_s5, %s1656_s6  }
 0x130 PF: > { %s1285_s22 = sand.u32 1, %s1621_s11   ;;  %p2317_p10 = scmp.ne.s32.totalorder %s2308_s25, 0 }
 0x131   : > { %p2318_p13 = scmp.ge.s32.totalorder %s1641_s16, 2  ;;  %s1286_s0 = scalar_lea.sflag [#allocation6], %s1285_s22 }
 0x133   : > { %p1432_p1 = pnand %p2318_p13, %p2317_p10 }
 0x135   : > { %1616 = dma.done.wait (!%p1432_p1), %s1286_s0, 1024  }
 0x136   : > { %1618 = vsyncadd (!%p1432_p1), %s1286_s0, 4294966272  ;;  %s19_s16 = sadd.s32 1, %s1641_s16   ;;  %s2319_s11 = smov %s1625_s12 }
 0x137   : > { %p16_p3 = scmp.ge.s32.totalorder %s19_s16, 4   ;;  %s2320_s12 = smov %s1629_s13 }
 0x138   : > { %s2321_s13 = smov %s1731_s24  ;;  %s2322_s14 = smov %s1637_s15 }
 0x139   : > { %s2323_s15 = smov %s2325_s18  ;;  %18 = sbr.rel (!%p16_p3) target bundleno = 8 (0x8), region = 69 }
 0x140   :  { %1291 = vsyncpa [#allocation5], 1 }
 0x141   :  { %1293 = vsyncpa [#allocation5 + $0x1], 1 }
 0x142   :  { %1294 = vsyncpa [#allocation6], 1 }
 0x143   :  { %1296 = vsyncpa [#allocation6 + $0x1], 1 }

</bundles_post_ra>
